<compile_context>
chip_gen: v6e
topology: v6e:2x2x1
jax: 0.10.0
libtpu: 0.0.40
codegen_flags: <defaults>
</compile_context>

<pallas_src>
import jax
import jax.numpy as jnp
from jax.experimental import pallas as pl
from jax.experimental.pallas import tpu as pltpu

_LANE = 128


def _bottleneck_kernel(x_ref, w_ref, shift_ref, o_ref):
    # x_ref:     (C_in, TM)    input channels x pixel tile (lane-dense)
    # w_ref:     (C_out, C_in) conv weight with BN scale folded in
    # shift_ref: (C_out, 1)    folded BN shift = beta - mean * scale (f32)
    # o_ref:     (C_out, TM)
    y = jnp.dot(w_ref[...], x_ref[...], preferred_element_type=jnp.float32)
    y = y + shift_ref[...]
    o_ref[...] = jnp.maximum(y, 0.0).astype(o_ref.dtype)


def _vmem_capacity_bytes():
    """Best-effort per-TensorCore VMEM capacity; conservative (v7x) fallback."""
    try:
        cap = getattr(pltpu.get_tpu_info(), "vmem_capacity_bytes", None)
        if cap:
            return int(cap)
    except Exception:
        pass
    try:
        kind = jax.devices()[0].device_kind.lower()
        if "v5" in kind or "v6" in kind:
            return 128 * 1024 * 1024
    except Exception:
        pass
    return 64 * 1024 * 1024


def _pick_pixel_tile(n_batch, m_pix, c_in, c_out, act_bytes, vmem_cap_bytes):
    """Largest lane-aligned pixel tile that fits the per-generation VMEM budget
    while keeping enough grid steps for megacore balance / pipelining."""
    if m_pix <= _LANE:
        return m_pix  # single tile == full dim (satisfies the block-shape rule)

    # Per-generation budget for the double-buffered working set.
    if vmem_cap_bytes <= 64 * 1024 * 1024:        # v7x: 64 MiB physical
        budget = 40 * 1024 * 1024
    else:                                          # v5e / v6e: 128 MiB
        budget = 80 * 1024 * 1024

    # Pallas double-buffers every input, including the grid-constant weight
    # and shift, so subtract them from the budget first.
    fixed = 2 * act_bytes * c_in * c_out + 2 * 4 * c_out
    per_pix = 2 * act_bytes * (c_in + c_out)       # x tile + out tile, 2 bufs
    avail = max(budget - fixed, per_pix * _LANE)
    max_tm = max(_LANE, (avail // per_pix) // _LANE * _LANE)

    # Never ask for more than the (lane-padded) pixel extent.
    tm = min(-(-m_pix // _LANE) * _LANE, max_tm)

    # Keep >= ~8 total grid steps when possible so both v7x TensorCores get
    # balanced work and DMA double-buffering has iterations to overlap.
    target_steps_per_batch = -(-8 // max(1, n_batch))   # ceil(8 / N)
    tm_occ = max(_LANE, (m_pix // target_steps_per_batch) // _LANE * _LANE)
    return max(_LANE, min(tm, tm_occ))


def bottleneck_forward(x_nchw, conv_w, gamma, beta, running_mean, running_var,
                       eps=1e-5):
    """Eval-mode Bottleneck forward.

    x_nchw : (N, C_in, H, W) float32 or bfloat16
    conv_w : (C_out, C_in, 1, 1) float32 (nn.Conv2d weight, bias=False)
    gamma, beta, running_mean, running_var : (C_out,) float32
    returns (N, C_out, H, W) in x_nchw.dtype
    """
    N, C_in, H, W = x_nchw.shape
    C_out = conv_w.shape[0]
    M_pix = H * W
    act_dtype = x_nchw.dtype
    act_bytes = jnp.dtype(act_dtype).itemsize

    # Fold BN (eval mode): scale into the weight (exact), keep shift separate.
    scale = (gamma / jnp.sqrt(running_var + eps)).astype(jnp.float32)   # (C_out,)
    shift = (beta - running_mean * scale).astype(jnp.float32)           # (C_out,)
    w_scaled = (conv_w[:, :, 0, 0].astype(jnp.float32)
                * scale[:, None]).astype(act_dtype)                     # (C_out, C_in)

    # NCHW kept as-is: view the spatial dims as one flattened (lane) pixel axis.
    x3 = x_nchw.reshape(N, C_in, M_pix)

    vmem_cap = _vmem_capacity_bytes()
    TM = _pick_pixel_tile(N, M_pix, C_in, C_out, act_bytes, vmem_cap)
    grid = (N, pl.cdiv(M_pix, TM))

    vmem_limit = (48 * 1024 * 1024 if vmem_cap <= 64 * 1024 * 1024
                  else 96 * 1024 * 1024)

    cost = pl.CostEstimate(
        flops=2 * N * M_pix * C_in * C_out,
        transcendentals=0,
        bytes_accessed=act_bytes * (N * M_pix * C_in
                                    + C_in * C_out
                                    + N * M_pix * C_out) + 4 * C_out,
    )

    out3 = pl.pallas_call(
        _bottleneck_kernel,
        out_shape=jax.ShapeDtypeStruct((N, C_out, M_pix), act_dtype),
        grid=grid,
        in_specs=[
            # batch dim squeezed out; pixel axis tiled (lane-dense); ragged
            # tail tile handled by Pallas edge-block masking.
            pl.BlockSpec((None, C_in, TM), lambda n, m: (n, 0, m)),
            # weight + shift resident across the whole grid.
            pl.BlockSpec((C_out, C_in), lambda n, m: (0, 0)),
            pl.BlockSpec((C_out, 1), lambda n, m: (0, 0)),
        ],
        out_specs=pl.BlockSpec((None, C_out, TM), lambda n, m: (n, 0, m)),
        compiler_params=pltpu.CompilerParams(
            dimension_semantics=("parallel", "parallel"),
            vmem_limit_bytes=vmem_limit,
        ),
        cost_estimate=cost,
    )(x3, w_scaled, shift.reshape(C_out, 1))

    return out3.reshape(N, C_out, H, W)


if __name__ == "__main__":
    key = jax.random.PRNGKey(0)
    k_x, k_w, k_g, k_b, k_m, k_v = jax.random.split(key, 6)

    N, C_in, H, W = 2, 4, 16, 16
    C_out = 8

    x = jax.random.normal(k_x, (N, C_in, H, W), dtype=jnp.float32)
    conv_w = jax.random.normal(k_w, (C_out, C_in, 1, 1), dtype=jnp.float32) * 0.1
    gamma = 1.0 + 0.1 * jax.random.normal(k_g, (C_out,), dtype=jnp.float32)
    beta = 0.1 * jax.random.normal(k_b, (C_out,), dtype=jnp.float32)
    running_mean = 0.1 * jax.random.normal(k_m, (C_out,), dtype=jnp.float32)
    running_var = 0.5 + jnp.abs(jax.random.normal(k_v, (C_out,), dtype=jnp.float32))

    out = bottleneck_forward(x, conv_w, gamma, beta, running_mean, running_var)
    out = jax.block_until_ready(out)

    # Pure-JAX reference check.
    eps = 1e-5
    x_nhwc = jnp.transpose(x, (0, 2, 3, 1))
    ref = jnp.einsum("nhwc,oc->nhwo", x_nhwc, conv_w[:, :, 0, 0])
    ref = (ref - running_mean) / jnp.sqrt(running_var + eps) * gamma + beta
    ref = jnp.maximum(ref, 0.0)
    ref = jnp.transpose(ref, (0, 3, 1, 2))
    assert out.shape == (N, C_out, H, W)
    assert jnp.allclose(out, ref, atol=1e-4, rtol=1e-4), "mismatch vs reference"

    print("KERNEL_OK")
</pallas_src>

<mosaic_0001>
module attributes {stable_mosaic.version = 11 : i64} {
  func.func @_bottleneck_kernel(%arg0: i32, %arg1: i32, %arg2: memref<1x4x128xf32, #tpu.memory_space<vmem>>, %arg3: memref<8x4xf32, #tpu.memory_space<vmem>>, %arg4: memref<8x1xf32, #tpu.memory_space<vmem>>, %arg5: memref<1x8x128xf32, #tpu.memory_space<vmem>>) attributes {dimension_semantics = [#tpu.dimension_semantics<parallel>, #tpu.dimension_semantics<parallel>], iteration_bounds = array<i64: 2, 2>, scalar_prefetch = 0 : i64, scratch_operands = 0 : i64, tpu.core_type = #tpu.core_type<tc>, window_params = [{transform_indices = @transform_0, window_bounds = array<i64: 1, 4, 128>}, {pipeline_mode = #tpu.pipeline_mode<synchronous>, transform_indices = @transform_1, window_bounds = array<i64: 8, 4>}, {pipeline_mode = #tpu.pipeline_mode<synchronous>, transform_indices = @transform_2, window_bounds = array<i64: 8, 1>}, {transform_indices = @transform_3, window_bounds = array<i64: 1, 8, 128>}]} {
    %c0 = arith.constant 0 : index
    %c0_0 = arith.constant 0 : index
    %0 = vector.load %arg3[%c0, %c0_0] : memref<8x4xf32, #tpu.memory_space<vmem>>, vector<8x4xf32>
    %c0_1 = arith.constant 0 : index
    %c0_2 = arith.constant 0 : index
    %c0_3 = arith.constant 0 : index
    %1 = vector.load %arg2[%c0_1, %c0_2, %c0_3] : memref<1x4x128xf32, #tpu.memory_space<vmem>>, vector<1x4x128xf32>
    %2 = vector.shape_cast %1 : vector<1x4x128xf32> to vector<4x128xf32>
    %cst = arith.constant dense<0.000000e+00> : vector<8x128xf32>
    %3 = tpu.matmul %0, %2, %cst {dimension_numbers = #tpu.dot_dimension_numbers<[1], [0], [0], [1], [0, 0, 1, 1], [], []>} : vector<8x4xf32>, vector<4x128xf32>, vector<8x128xf32> -> vector<8x128xf32>
    %c0_4 = arith.constant 0 : index
    %c0_5 = arith.constant 0 : index
    %4 = vector.load %arg4[%c0_4, %c0_5] : memref<8x1xf32, #tpu.memory_space<vmem>>, vector<8x1xf32>
    %5 = vector.broadcast %4 : vector<8x1xf32> to vector<8x128xf32>
    %6 = arith.addf %3, %5 : vector<8x128xf32>
    %cst_6 = arith.constant 0.000000e+00 : f32
    %7 = vector.broadcast %cst_6 : f32 to vector<8x128xf32>
    %8 = arith.maximumf %6, %7 : vector<8x128xf32>
    %c0_7 = arith.constant 0 : index
    %c0_8 = arith.constant 0 : index
    %c0_9 = arith.constant 0 : index
    %9 = vector.load %arg5[%c0_7, %c0_8, %c0_9] : memref<1x8x128xf32, #tpu.memory_space<vmem>>, vector<1x8x128xf32>
    %10 = vector.shape_cast %9 : vector<1x8x128xf32> to vector<8x128xf32>
    %11 = vector.shape_cast %8 : vector<8x128xf32> to vector<1x8x128xf32>
    tpu.vector_store %arg5[%c0_7, %c0_8, %c0_9], %11 {strides = array<i32>} : memref<1x8x128xf32, #tpu.memory_space<vmem>>, vector<1x8x128xf32>,
    return
  }
  func.func @transform_0(%arg0: i32, %arg1: i32) -> (i32, i32, i32) {
    %c0_i32 = arith.constant 0 : i32
    %c0_i32_0 = arith.constant 0 : i32
    return %arg0, %c0_i32, %arg1 : i32, i32, i32
  }
  func.func @transform_1(%arg0: i32, %arg1: i32) -> (i32, i32) {
    %c0_i32 = arith.constant 0 : i32
    %c0_i32_0 = arith.constant 0 : i32
    %c0_i32_1 = arith.constant 0 : i32
    return %c0_i32, %c0_i32_0 : i32, i32
  }
  func.func @transform_2(%arg0: i32, %arg1: i32) -> (i32, i32) {
    %c0_i32 = arith.constant 0 : i32
    %c0_i32_0 = arith.constant 0 : i32
    %c0_i32_1 = arith.constant 0 : i32
    return %c0_i32, %c0_i32_0 : i32, i32
  }
  func.func @transform_3(%arg0: i32, %arg1: i32) -> (i32, i32, i32) {
    %c0_i32 = arith.constant 0 : i32
    %c0_i32_0 = arith.constant 0 : i32
    return %arg0, %c0_i32, %arg1 : i32, i32, i32
  }
}

</mosaic_0001>

<bundles_post_ra>
// kernel: tpu_custom_call.1
= control target key start
LH: loop header
LB: loop body
LE: loop exit
PB: predicated region body
PF: predicated region fallthrough
CT: control target
= control target key end

     0   :  { %8 = vsyncpa [#allocation3], 0  ;;  %s721_s0 = inlined_call_operand.vmem [shape: f32[2,4,256], index: 0, kind: input, shape index: {}]   ;;  %s722_s1 = inlined_call_operand.vmem [shape: f32[8,4], index: 1, kind: input, shape index: {}]   ;;  %s723_s2 = inlined_call_operand.vmem [shape: f32[8,1], index: 2, kind: input, shape index: {}]   ;;  %s724_s3 = inlined_call_operand.hbm [shape: f32[2,8,256], index: 3, kind: output, shape index: {}]  }
   0x1   :  { %10 = vsyncpa [#allocation3 + $0x1], 0  ;;  %s591_s12 = smov 0   ;;  %s593_s13 = smov 0  }
   0x2   :  { %s595_s14 = smov 0   ;;  %s597_s15 = smov 0  }
   0x3   :  { %s599_s16 = smov 0   ;;  %s601_s17 = smov 0  }
   0x4   :  { %s603_s18 = smov 0   ;;  %s605_s19 = smov 0  }
   0x5 LB: > { %s376_s20 = sadd.s32 4294967295, %s565_s19   ;;  %s377_s21 = sadd.s32 4294967294, %s565_s19   ;;  %s565_s19 = sphi %s605_s19, %s16_s19   ;;  %s561_s18 = sphi %s603_s18, %s733_s18   ;;  %s557_s17 = sphi %s601_s17, %s732_s17   ;;  %s553_s16 = sphi %s599_s16, %s731_s16   ;;  %s549_s15 = sphi %s597_s15, %s730_s15   ;;  %s545_s14 = sphi %s595_s14, %s729_s14   ;;  %s541_s13 = sphi %s593_s13, %s728_s13   ;;  %s537_s12 = sphi %s591_s12, %s727_s12  }
   0x6   : > { %s25_s22 = sadd.s32 1, %s557_s17  ;;  %s28_s23 = sadd.s32 1, %s561_s18 }
   0x7   : > { %p26_p0 = scmp.ge.s32.totalorder %s25_s22, 2  ;;  %p117_p1 = scmp.ne.s32.totalorder %s545_s14, %s541_s13 }
   0x8   : > { %p118_p2 = scmp.eq.s32.totalorder %s376_s20, 3  ;;  %p123_p5 = scmp.ne.s32.totalorder %s541_s13, %s537_s12 }
   0x9   : > { %s735_s22 = smov (%p26_p0, %s25_s22), 0  ;;  %s737_s23 = smov (!%p26_p0, %s28_s23), %s561_s18 }
   0xa   : > { %s103_s24 = ssub.s32 %s557_s17, %s735_s22  ;;  %p642_p3 = por %p118_p2, %p117_p1 }
   0xb   : > { %p30_p4 = scmp.ge.s32.totalorder %s737_s23, 2  ;;  %p124_p6 = scmp.eq.s32.totalorder %s377_s21, 3 }
   0xc   : > { %p380_p7 = scmp.ge.s32.totalorder %s565_s19, 1  ;;  %p159_p9 = scmp.lt.s32.totalorder %s565_s19, 5 }
   0xd   : > { %s739_s23 = smov (%p30_p4, %s737_s23), 0  ;;  %p651_p8 = por %p124_p6, %p123_p5 }
   0xe   : > { %s102_s27 = ssub.s32 %s561_s18, %s739_s23  ;;  %s107_s28 = sadd.s32 1, %s545_s14 }
   0xf   : > { %s104_s29 = sor.u32 %s103_s24, %s102_s27  ;;  %p160_p10 = pnand %p380_p7, %p159_p9 }
  0x10   : > { %p105_p11 = scmp.eq.s32.totalorder %s104_s29, 0  ;;  %p186_p12 = scmp.lt.s32.totalorder (!%p160_p10), %s553_s16, 1 }
  0x11   : > { %163 = sbr.rel (%p160_p10) target bundleno = 240 (0xf0), region = 32  ;;  %p188_p13 = scmp.lt.s32.totalorder (!%p160_p10), %s549_s15, 1 }
  0x12   : > { %s660_s30 = scalar_select %p105_p11, %s545_s14, %s107_s28  }
  0x13   : > { %s183_s28 = sand.u32 (!%p160_p10), 1, %s541_s13   ;;  %s387_s4 = sshll.u32 (!%p160_p10), %s553_s16, 1 }
  0x14   : > { %s381_s29 = sshll.u32 (!%p160_p10), %s183_s28, 3  ;;  %s294_s5 = sadd.s32 (!%p160_p10), %s549_s15, %s387_s4 }
  0x15   : > { %s283_s20 = scalar_lea.sflag (!%p160_p10), [#allocation3], %s183_s28 }
  0x16   : > { %v567_v0 = vmov 0.0   ;;  %vm568_vm0 = vmmov 0   ;;  %v196_v1 = vld [vmem:[%s723_s2] sm:$0xff]  ;;  %s187_s6 = scalar_select %p186_p12, %s553_s16, 1  ;;  %v569_v2 = vmov 0   ;;  %vm206_vm1 = vcmask 1043456  }
  0x17   : > { %393 = vmatprep.subr.mxu0 %v567_v0  ;;  %395 = vmatprep.mubr.msk.f32.mxu0 %vm568_vm0, %v567_v0  ;;  %s189_s7 = scalar_select %p188_p13, %s549_s15, 1  ;;  %v194_v3 = vld [vmem:[%s722_s1] sm:$0xff]  ;;  %vm202_vm2 = vcmask 31744  }
  0x18   : > { %472 = vset.pattern.permute.xlu0 %v569_v2  ;;  %s382_s8 = sshll.u32 %s187_s6, 1  ;;  %s388_s6 = sshll.u32 %s294_s5, 7 }
  0x19   : > { %199 = vperm.xlu0 %472, %v196_v1   ;;  %s191_s9 = sadd.s32 %s382_s8, %s189_s7  ;;  %s185_s7 = scalar_lea.vmem [#allocation2], %s381_s29 }
  0x1a   : > { %s383_s10 = sshll.u32 %s191_s9, 2  ;;  %s298_s8 = sshll.u32 %s185_s7, 4  ;;  %s299_s8 = int_to_ptr.vmem [resolvable:$true] %s298_s8 }
  0x1b   : > { %s193_s21 = scalar_lea.vmem %s721_s0, %s383_s10  ;;  %s296_s11 = scalar_lea.hbm %s724_s3, %s388_s6 }
  0x1c   : > { %v195_v4 = vld [vmem:[%s193_s21] sm:$0xf]  ;;  %s473_s21 = scalar_lea.vmem %s299_s8, 128  ;;  %s570_s15 = smov [#allocation2]  }
  0x1d   : > { %394 = vmatpush3.msk.msra.mxu0 %vm206_vm1, %v195_v4  ;;  %p474_p0 = scmp.ne.s32.totalorder %s299_s8, %s473_s21  ;;  %s477_s16 = sshll.u32 %s570_s15, 4  ;;  %s478_s16 = int_to_ptr.vmem [resolvable:$false] %s477_s16 }
  0x1e   : > { %396 = vmatmul.mubr.msk.f32.vlgmr.msra.gmra.mxu0 %vm202_vm2, %v194_v3  ;;  %s479_s24 = scalar_lea.vmem %s478_s16, 256  ;;  %p480_p4 = scmp.lt.s32.totalorder %s299_s8, %s478_s16 }
  0x1f   : > { %p475_p1 = pnand %p474_p0, %p642_p3  ;;  %p481_p5 = scmp.lt.s32.totalorder %s479_s24, %s473_s21 }
  0x21   : > { %p476_p2 = pneg %p475_p1  ;;  %p482_p6 = por %p481_p5, %p480_p4 }
  0x23   : > { %p483_p7 = pnand %p482_p6, %p476_p2 }
  0x94   : > { %v200_v5 = vpop.permute.xlu0 %199 }
  0xde   : > { %v276_v6 = vpop.f32.mrf.mxu0 }
  0xdf   : > { %v277_v7 = vadd.f32 %v276_v6, %v200_v5 }
  0xe0   : > { %v397_v8 = vpop.f32.mrf.mxu0 }
  0xe1   : > { %v280_v9 = vmax.f32 %v277_v7, 0.0 }
  0xe3   : > { %281 = vst [vmem:[%s185_s7] sm:$0xff] %v280_v9 }
  0xe4   : > { %486 = shalt.err (!%p483_p7)
}
  0xe5   : > { %s487_s27 = scalar_lea.hbm %s296_s11, 128  ;;  %s491_s4 = scalar_lea.hbm %s724_s3, 512 }
  0xe6   : > { %p488_p9 = scmp.ne.s32.totalorder %s296_s11, %s487_s27  ;;  %p492_p12 = scmp.lt.s32.totalorder %s296_s11, %s724_s3 }
  0xe7   : > { %p493_p13 = scmp.lt.s32.totalorder %s491_s4, %s487_s27 }
  0xe8   : > { %p489_p10 = pnand %p488_p9, %p642_p3 }
  0xe9   : > { %p494_p0 = por %p493_p13, %p492_p12 }
  0xea   : > { %p490_p11 = pneg %p489_p10 }
  0xec   : > { %p495_p1 = pnand %p494_p0, %p490_p11 }
  0xee   : > { %498 = shalt.err (!%p495_p1)
}
  0xef   : > { %398 = dma.vmem_to_hbm [thread:$0]  (%p642_p3), %s299_s8, 128, %s296_s11, %s283_s20  }
  0xf0 PF: > { %p404_p2 = scmp.ge.s32.totalorder %s565_s19, 2  ;;  %s310_s7 = sand.u32 1, %s537_s12  }
  0xf1   : > { %s311_s9 = scalar_lea.sflag [#allocation3], %s310_s7 }
  0xf2   : > { %p401_p4 = pnand %p404_p2, %p651_p8 }
  0xf4   : > { %p402_p5 = pneg %p401_p4 }
  0xf6   : > { %532 = dma.done.wait (%p402_p5), %s311_s9, 128  }
  0xf7   : > { %534 = vsyncadd (%p402_p5), %s311_s9, 4294967168  ;;  %s16_s19 = sadd.s32 1, %s565_s19   ;;  %s727_s12 = smov %s541_s13 }
  0xf8   : > { %p13_p6 = scmp.ge.s32.totalorder %s16_s19, 6   ;;  %s728_s13 = smov %s545_s14 }
  0xf9   : > { %s729_s14 = smov %s660_s30  ;;  %s730_s15 = smov %s557_s17 }
  0xfa   : > { %s731_s16 = smov %s561_s18  ;;  %s732_s17 = smov %s735_s22 }
  0xfb   : > { %s733_s18 = smov %s739_s23  ;;  %15 = sbr.rel (!%p13_p6) target bundleno = 5 (0x5), region = 67 }
 0x100   :  { %316 = vsyncpa [#allocation3], 1 }
 0x101   :  { %318 = vsyncpa [#allocation3 + $0x1], 1 }

</bundles_post_ra>
